<compile_context>
chip_gen: v5e
topology: v5e:2x2
jax: 0.10.0
libtpu: 0.0.40
codegen_flags: <defaults>
</compile_context>

<pallas_src>
import functools

import jax
import jax.numpy as jnp
from jax.experimental import pallas as pl
from jax.experimental.pallas import tpu as pltpu

_LANE = 128


def _l2_pool_kernel(x_ref, o_ref, sq_ref, rs_ref, *, ksize, stride, pad):
    # x_ref : (1, H,  W,  Cb)   input tile (NHWC, channel tile on lanes)
    # o_ref : (1, H2, W2, Cb)   output tile
    # sq_ref: (H+2p, W+2p, Cb)  f32 zero-padded x^2 (halo built in VMEM, not HBM)
    # rs_ref: (H+2p, W2,   Cb)  f32 row sums (used on the strided path)
    H, W = x_ref.shape[1], x_ref.shape[2]
    H2, W2 = o_ref.shape[1], o_ref.shape[2]
    k, s, p = ksize, stride, pad

    v = x_ref[0].astype(jnp.float32)
    if p > 0:
        sq_ref[...] = jnp.zeros(sq_ref.shape, jnp.float32)
        sq_ref[p:p + H, p:p + W, :] = v * v
    else:
        sq_ref[...] = v * v

    inv = 1.0 / float(k * k)  # count_include_pad=True divisor

    if s == 1:
        # Pass 1: window sums along W (contiguous sublane-shifted slices, lanes untouched).
        rs = sq_ref[:, 0:W2, :]
        for j in range(1, k):
            rs = rs + sq_ref[:, j:j + W2, :]
        # Pass 2: window sums along H (untiled leading axis; free vreg selection).
        acc = rs[0:H2]
        for j in range(1, k):
            acc = acc + rs[j:j + H2]
        o_ref[0] = jnp.sqrt(acc * inv).astype(o_ref.dtype)
    else:
        # TODO(synk): for large strided outputs a strided ref read
        # (ref[pl.ds(start, n, stride)]) would be tighter than this static unrolled
        # gather; the unrolled form is used here for maximum lowering portability.
        for ow in range(W2):
            c0 = ow * s
            col = sq_ref[:, c0:c0 + 1, :]
            for j in range(1, k):
                col = col + sq_ref[:, c0 + j:c0 + j + 1, :]
            rs_ref[:, ow:ow + 1, :] = col
        rows = []
        for oh in range(H2):
            r0 = oh * s
            row = rs_ref[r0:r0 + 1]
            for j in range(1, k):
                row = row + rs_ref[r0 + j:r0 + j + 1]
            rows.append(row)
        acc = jnp.concatenate(rows, axis=0)
        o_ref[0] = jnp.sqrt(acc * inv).astype(o_ref.dtype)


def l2_pooling(x, kernel_size, stride, padding):
    """sqrt(AvgPool2d(k, s, p)(x**2)) for NCHW `x` (PyTorch L2Pooling forward)."""
    N, C, H, W = x.shape
    k, s, p = int(kernel_size), int(stride), int(padding)
    H2 = (H + 2 * p - k) // s + 1
    W2 = (W + 2 * p - k) // s + 1

    # NCHW -> NHWC (layout only): channel axis on lanes.
    xh = jnp.transpose(x, (0, 2, 3, 1))

    # Lane tiling: 128-wide channel tiles when C > 128 (pad C up to a multiple of 128),
    # otherwise the full (small) channel dim as a single full-extent tile.
    if C > _LANE:
        cb = _LANE
        c_pad = ((C + _LANE - 1) // _LANE) * _LANE
        if c_pad != C:
            xh = jnp.pad(xh, ((0, 0), (0, 0), (0, 0), (0, c_pad - C)))
    else:
        cb = C
        c_pad = C
    # TODO(synk): for very small C (and stride 1) lane density could be improved further
    # by folding W or N onto the lane axis; kept generic here for arbitrary stride.

    hp, wp = H + 2 * p, W + 2 * p
    itemsize = jnp.dtype(xh.dtype).itemsize
    blk_bytes = (H * W + H2 * W2) * cb * itemsize      # in + out blocks
    scr_bytes = (hp * wp + hp * W2) * cb * 4           # f32 scratches
    vmem_bytes = int(min(48 << 20, max(8 << 20, 4 * (2 * blk_bytes + scr_bytes))))

    kernel = functools.partial(_l2_pool_kernel, ksize=k, stride=s, pad=p)
    out = pl.pallas_call(
        kernel,
        out_shape=jax.ShapeDtypeStruct((N, H2, W2, c_pad), xh.dtype),
        grid=(N, c_pad // cb),
        in_specs=[pl.BlockSpec((1, H, W, cb), lambda n, c: (n, 0, 0, c))],
        out_specs=pl.BlockSpec((1, H2, W2, cb), lambda n, c: (n, 0, 0, c)),
        scratch_shapes=[
            pltpu.VMEM((hp, wp, cb), jnp.float32),
            pltpu.VMEM((hp, W2, cb), jnp.float32),
        ],
        compiler_params=pltpu.CompilerParams(
            dimension_semantics=("parallel", "parallel"),
            vmem_limit_bytes=vmem_bytes,
        ),
    )(xh)

    if c_pad != C:
        out = out[..., :C]
    return jnp.transpose(out, (0, 3, 1, 2))            # NHWC -> NCHW


def _reference_l2_pool(x, k, s, p):
    """Pure-JAX reference: sqrt(avg_pool(x^2)) with count_include_pad=True."""
    sq = x.astype(jnp.float32) ** 2
    summed = jax.lax.reduce_window(
        sq, 0.0, jax.lax.add,
        window_dimensions=(1, 1, k, k),
        window_strides=(1, 1, s, s),
        padding=[(0, 0), (0, 0), (p, p), (p, p)],
    )
    return jnp.sqrt(summed * (1.0 / float(k * k))).astype(x.dtype)


if __name__ == "__main__":
    key = jax.random.PRNGKey(0)
    jitted = jax.jit(l2_pooling, static_argnames=("kernel_size", "stride", "padding"))

    # (shape NCHW, kernel_size, stride, padding)
    cases = [
        ((2, 4, 16, 16), 3, 1, 1),     # facenet inception pool-branch config (small C)
        ((2, 256, 16, 16), 3, 1, 1),   # lane-dense: C tiled at 128 -> grid (2, 2)
        ((2, 160, 16, 16), 5, 1, 2),   # non-multiple-of-128 channels (padded to 256)
        ((2, 128, 16, 16), 3, 2, 1),   # strided (downsampling) pooling
        ((2, 4, 16, 16), 2, 2, 0),     # even kernel, no padding
    ]

    for i, (shape, k, s, p) in enumerate(cases):
        x = jax.random.normal(jax.random.fold_in(key, i), shape, jnp.float32)
        out = jax.block_until_ready(jitted(x, kernel_size=k, stride=s, padding=p))
        expect = _reference_l2_pool(x, k, s, p)
        assert out.shape == expect.shape, (i, out.shape, expect.shape)
        assert bool(jnp.all(jnp.isfinite(out))), f"non-finite output in case {i}"
        assert bool(jnp.allclose(out, expect, atol=1e-5, rtol=1e-5)), f"mismatch in case {i}"

    print("KERNEL_OK")
</pallas_src>

<mosaic_0001>
module attributes {stable_mosaic.version = 11 : i64} {
  func.func @_l2_pool_kernel(%arg0: i32, %arg1: i32, %arg2: memref<1x16x16x4xf32, #tpu.memory_space<vmem>>, %arg3: memref<1x16x16x4xf32, #tpu.memory_space<vmem>>, %arg4: memref<18x18x4xf32, #tpu.memory_space<vmem>>, %arg5: memref<18x16x4xf32, #tpu.memory_space<vmem>>) attributes {dimension_semantics = [#tpu.dimension_semantics<parallel>, #tpu.dimension_semantics<parallel>], iteration_bounds = array<i64: 2, 1>, scalar_prefetch = 0 : i64, scratch_operands = 2 : i64, tpu.core_type = #tpu.core_type<tc>, window_params = [{transform_indices = @transform_0, window_bounds = array<i64: 1, 16, 16, 4>}, {transform_indices = @transform_1, window_bounds = array<i64: 1, 16, 16, 4>}]} {
    %c0 = arith.constant 0 : index
    %c0_0 = arith.constant 0 : index
    %c0_1 = arith.constant 0 : index
    %c0_2 = arith.constant 0 : index
    %0 = vector.load %arg2[%c0, %c0_0, %c0_1, %c0_2] : memref<1x16x16x4xf32, #tpu.memory_space<vmem>>, vector<1x16x16x4xf32>
    %1 = vector.shape_cast %0 : vector<1x16x16x4xf32> to vector<16x16x4xf32>
    %cst = arith.constant 0.000000e+00 : f32
    %2 = vector.broadcast %cst : f32 to vector<18x18x4xf32>
    %c0_3 = arith.constant 0 : index
    %c0_4 = arith.constant 0 : index
    %c0_5 = arith.constant 0 : index
    %3 = vector.load %arg4[%c0_3, %c0_4, %c0_5] : memref<18x18x4xf32, #tpu.memory_space<vmem>>, vector<18x18x4xf32>
    tpu.vector_store %arg4[%c0_3, %c0_4, %c0_5], %2 {strides = array<i32>} : memref<18x18x4xf32, #tpu.memory_space<vmem>>, vector<18x18x4xf32>,
    %4 = arith.mulf %1, %1 : vector<16x16x4xf32>
    %c1 = arith.constant 1 : index
    %c1_6 = arith.constant 1 : index
    %c0_7 = arith.constant 0 : index
    %5 = vector.load %arg4[%c1, %c1_6, %c0_7] : memref<18x18x4xf32, #tpu.memory_space<vmem>>, vector<16x16x4xf32>
    tpu.vector_store %arg4[%c1, %c1_6, %c0_7], %4 {strides = array<i32>} : memref<18x18x4xf32, #tpu.memory_space<vmem>>, vector<16x16x4xf32>,
    %c0_8 = arith.constant 0 : index
    %c0_9 = arith.constant 0 : index
    %c0_10 = arith.constant 0 : index
    %6 = vector.load %arg4[%c0_8, %c0_9, %c0_10] : memref<18x18x4xf32, #tpu.memory_space<vmem>>, vector<18x16x4xf32>
    %c0_11 = arith.constant 0 : index
    %c1_12 = arith.constant 1 : index
    %c0_13 = arith.constant 0 : index
    %7 = vector.load %arg4[%c0_11, %c1_12, %c0_13] : memref<18x18x4xf32, #tpu.memory_space<vmem>>, vector<18x16x4xf32>
    %8 = arith.addf %6, %7 : vector<18x16x4xf32>
    %c0_14 = arith.constant 0 : index
    %c2 = arith.constant 2 : index
    %c0_15 = arith.constant 0 : index
    %9 = vector.load %arg4[%c0_14, %c2, %c0_15] : memref<18x18x4xf32, #tpu.memory_space<vmem>>, vector<18x16x4xf32>
    %10 = arith.addf %8, %9 : vector<18x16x4xf32>
    %11 = vector.extract_strided_slice %10 {offsets = [0, 0, 0], sizes = [16, 16, 4], strides = [1, 1, 1]} : vector<18x16x4xf32> to vector<16x16x4xf32>
    %12 = vector.extract_strided_slice %10 {offsets = [1, 0, 0], sizes = [16, 16, 4], strides = [1, 1, 1]} : vector<18x16x4xf32> to vector<16x16x4xf32>
    %13 = arith.addf %11, %12 : vector<16x16x4xf32>
    %14 = vector.extract_strided_slice %10 {offsets = [2, 0, 0], sizes = [16, 16, 4], strides = [1, 1, 1]} : vector<18x16x4xf32> to vector<16x16x4xf32>
    %15 = arith.addf %13, %14 : vector<16x16x4xf32>
    %cst_16 = arith.constant 0.111111112 : f32
    %16 = vector.broadcast %cst_16 : f32 to vector<16x16x4xf32>
    %17 = arith.mulf %15, %16 : vector<16x16x4xf32>
    %18 = math.sqrt %17 : vector<16x16x4xf32>
    %c0_17 = arith.constant 0 : index
    %c0_18 = arith.constant 0 : index
    %c0_19 = arith.constant 0 : index
    %c0_20 = arith.constant 0 : index
    %19 = vector.load %arg3[%c0_17, %c0_18, %c0_19, %c0_20] : memref<1x16x16x4xf32, #tpu.memory_space<vmem>>, vector<1x16x16x4xf32>
    %20 = vector.shape_cast %19 : vector<1x16x16x4xf32> to vector<16x16x4xf32>
    %21 = vector.shape_cast %18 : vector<16x16x4xf32> to vector<1x16x16x4xf32>
    tpu.vector_store %arg3[%c0_17, %c0_18, %c0_19, %c0_20], %21 {strides = array<i32>} : memref<1x16x16x4xf32, #tpu.memory_space<vmem>>, vector<1x16x16x4xf32>,
    return
  }
  func.func @transform_0(%arg0: i32, %arg1: i32) -> (i32, i32, i32, i32) {
    %c0_i32 = arith.constant 0 : i32
    %c0_i32_0 = arith.constant 0 : i32
    %c0_i32_1 = arith.constant 0 : i32
    return %arg0, %c0_i32, %c0_i32_0, %arg1 : i32, i32, i32, i32
  }
  func.func @transform_1(%arg0: i32, %arg1: i32) -> (i32, i32, i32, i32) {
    %c0_i32 = arith.constant 0 : i32
    %c0_i32_0 = arith.constant 0 : i32
    %c0_i32_1 = arith.constant 0 : i32
    return %arg0, %c0_i32, %c0_i32_0, %arg1 : i32, i32, i32, i32
  }
}

</mosaic_0001>

<bundles_post_ra>
// kernel: l2_pooling.1
= control target key start
LH: loop header
LB: loop body
LE: loop exit
PB: predicated region body
PF: predicated region fallthrough
CT: control target
= control target key end

     0   :  { %s1213_s6 = smov 0   ;;  %s1215_s7 = smov 0   ;;  %s2042_s0 = inlined_call_operand.vmem [shape: f32[2,16,16,4], index: 0, kind: input, shape index: {}]   ;;  %s2043_s1 = inlined_call_operand.vmem [shape: f32[2,16,16,4], index: 1, kind: output, shape index: {}]  }
   0x1   :  { %s1217_s8 = smov 0  }
   0x2 LB: > { %s23_s9 = sadd.s32 1, %s1196_s7  ;;  %p1080_p0 = scmp.ge.s32.totalorder %s1200_s8, 1  ;;  %s1200_s8 = sphi %s1217_s8, %s11_s8   ;;  %s1196_s7 = sphi %s1215_s7, %s2045_s7   ;;  %s1192_s6 = sphi %s1213_s6, %s2044_s6  }
   0x3   : > { %p25_p1 = scmp.ge.s32.totalorder %s23_s9, 2  ;;  %p106_p2 = scmp.lt.s32.totalorder %s1200_s8, 3 }
   0x5   : > { %s2047_s9 = smov (%p25_p1, %s23_s9), 0  ;;  %p107_p3 = pnand %p1080_p0, %p106_p2 }
   0x6   : > { %p132_p4 = scmp.lt.s32.totalorder (!%p107_p3), %s1192_s6, 1 }
   0x7   : > { %110 = sbr.rel (%p107_p3) target bundleno = 226 (0xe2), region = 24 }
   0xc   : > { %vm180_vm0 = vcmask 31744   ;;  %v1202_v0 = vmov 0.0   ;;  %vm183_vm1 = vcmask 25600   ;;  %s2049_s6 = smov (!%p132_p4, %s1192_s6), 1 }
   0xd   : > { %181 = vst.msk [vmem:[#allocation2] sm:$0xff] %vm180_vm0, %v1202_v0  ;;  %s1087_s10 = sshll.u32 %s2049_s6, 8 }
   0xe   : > { %182 = vst.msk [vmem:[#allocation2 + $0x8] sm:$0xff] %vm180_vm0, %v1202_v0  ;;  %s1333_s13 = scalar_lea.vmem %s2042_s0, %s1087_s10  ;;  %s1508_s16 = scalar_lea.vmem %s2043_s1, %s1087_s10 }
   0xf   : > { %185 = vst.msk [vmem:[#allocation2 + $0x18] sm:$0xff] %vm180_vm0, %v1202_v0  ;;  %v148_v1 = vld [vmem:[%s1333_s13] sm:$0xff]  ;;  %v149_v2 = vld [vmem:[%s1333_s13 + $0x8] sm:$0xff]  ;;  %v150_v3 = vld [vmem:[%s1333_s13 + $0x10] sm:$0xff] }
  0x10   : > { %186 = vst.msk [vmem:[#allocation2 + $0x20] sm:$0xff] %vm180_vm0, %v1202_v0  ;;  %v236_v4 = vmul.f32 %v148_v1, %v148_v1  ;;  %v151_v5 = vld [vmem:[%s1333_s13 + $0x18] sm:$0xff]  ;;  %v237_v6 = vmul.f32 %v149_v2, %v149_v2  ;;  %v152_v7 = vld [vmem:[%s1333_s13 + $0x20] sm:$0xff]  ;;  %v238_v8 = vmul.f32 %v150_v3, %v150_v3  ;;  %v153_v9 = vld [vmem:[%s1333_s13 + $0x28] sm:$0xff] }
  0x11   : > { %188 = vst.msk [vmem:[#allocation2 + $0x30] sm:$0xff] %vm180_vm0, %v1202_v0  ;;  %v239_v10 = vmul.f32 %v151_v5, %v151_v5  ;;  %v154_v11 = vld [vmem:[%s1333_s13 + $0x30] sm:$0xff]  ;;  %v240_v12 = vmul.f32 %v152_v7, %v152_v7  ;;  %v155_v13 = vld [vmem:[%s1333_s13 + $0x38] sm:$0xff]  ;;  %v241_v14 = vmul.f32 %v153_v9, %v153_v9  ;;  %v156_v15 = vld [vmem:[%s1333_s13 + $0x40] sm:$0xff] }
  0x12   : > { %189 = vst.msk [vmem:[#allocation2 + $0x38] sm:$0xff] %vm180_vm0, %v1202_v0  ;;  %v242_v16 = vmul.f32 %v154_v11, %v154_v11  ;;  %v157_v17 = vld [vmem:[%s1333_s13 + $0x48] sm:$0xff]  ;;  %v243_v20 = vmul.f32 %v155_v13, %v155_v13  ;;  %v158_v21 = vld [vmem:[%s1333_s13 + $0x50] sm:$0xff]  ;;  %v244_v24 = vmul.f32 %v156_v15, %v156_v15  ;;  %v159_v25 = vld [vmem:[%s1333_s13 + $0x58] sm:$0xff] }
  0x13   : > { %191 = vst.msk [vmem:[#allocation2 + $0x48] sm:$0xff] %vm180_vm0, %v1202_v0  ;;  %v245_v27 = vmul.f32 %v157_v17, %v157_v17  ;;  %v160_v28 = vld [vmem:[%s1333_s13 + $0x60] sm:$0xff]  ;;  %v246_v30 = vmul.f32 %v158_v21, %v158_v21  ;;  %v161_v31 = vld [vmem:[%s1333_s13 + $0x68] sm:$0xff]  ;;  %v162_v32 = vld [vmem:[%s1333_s13 + $0x70] sm:$0xff]  ;;  %v247_v37 = vmul.f32 %v159_v25, %v159_v25 }
  0x14   : > { %192 = vst.msk [vmem:[#allocation2 + $0x50] sm:$0xff] %vm180_vm0, %v1202_v0  ;;  %v301_v18 = vld [vmem:[#allocation2] sm:$0xff]  ;;  %v163_v33 = vld [vmem:[%s1333_s13 + $0x78] sm:$0xff]  ;;  %v248_v43 = vmul.f32 %v160_v28, %v160_v28  ;;  %v165_v44 = vld [vmem:[%s1333_s13 + $0x88] sm:$0xff]  ;;  %v249_v49 = vmul.f32 %v161_v31, %v161_v31  ;;  %v250_v57 = vmul.f32 %v162_v32, %v162_v32 }
  0x15   : > { %194 = vst.msk [vmem:[#allocation2 + $0x60] sm:$0xff] %vm180_vm0, %v1202_v0  ;;  %v337_v19 = vld [vmem:[#allocation2 + $0x1] sm:$0xff]  ;;  %v166_v50 = vld [vmem:[%s1333_s13 + $0x90] sm:$0xff]  ;;  %v167_v58 = vld [vmem:[%s1333_s13 + $0x98] sm:$0xff]  ;;  %v251_v1 = vmul.f32 %v163_v33, %v163_v33  ;;  %v253_v11 = vmul.f32 %v165_v44, %v165_v44 }
  0x16   : > { %195 = vst.msk [vmem:[#allocation2 + $0x68] sm:$0xff] %vm180_vm0, %v1202_v0  ;;  %v302_v22 = vld [vmem:[#allocation2 + $0x8] sm:$0xff]  ;;  %v373_v29 = vadd.f32 %v337_v19, %v301_v18  ;;  %v164_v38 = vld [vmem:[%s1333_s13 + $0x80] sm:$0xff]  ;;  %v255_v19 = vmul.f32 %v167_v58, %v167_v58  ;;  %v171_v28 = vld [vmem:[%s1333_s13 + $0xb8] sm:$0xff] }
  0x17   : > { %197 = vst.msk [vmem:[#allocation2 + $0x78] sm:$0xff] %vm180_vm0, %v1202_v0  ;;  %v409_v26 = vld [vmem:[#allocation2 + $0x2] sm:$0xff]  ;;  %v252_v7 = vmul.f32 %v164_v38, %v164_v38  ;;  %v175_v38 = vld [vmem:[%s1333_s13 + $0xd8] sm:$0xff]  ;;  %v259_v44 = vmul.f32 %v171_v28, %v171_v28 }
  0x18   : > { %198 = vst.msk [vmem:[#allocation2 + $0x80] sm:$0xff] %vm180_vm0, %v1202_v0  ;;  %v445_v51 = vadd.f32 %v409_v26, %v373_v29  ;;  %v169_v15 = vld [vmem:[%s1333_s13 + $0xa8] sm:$0xff]  ;;  %v172_v32 = vld [vmem:[%s1333_s13 + $0xc0] sm:$0xff] }
  0x19   : > { %200 = vst.msk [vmem:[#allocation2 + $0x90] sm:$0xff] %vm180_vm0, %v1202_v0  ;;  %v257_v31 = vmul.f32 %v169_v15, %v169_v15  ;;  %v173_v33 = vld [vmem:[%s1333_s13 + $0xc8] sm:$0xff] }
  0x1a   : > { %201 = vst.msk [vmem:[#allocation2 + $0x98] sm:$0xff] %vm180_vm0, %v1202_v0 }
  0x1b   : > { %203 = vst.msk [vmem:[#allocation2 + $0xa8] sm:$0xff] %vm180_vm0, %v1202_v0 }
  0x1c   : > { %204 = vst.msk [vmem:[#allocation2 + $0xb0] sm:$0xff] %vm180_vm0, %v1202_v0 }
  0x1d   : > { %206 = vst.msk [vmem:[#allocation2 + $0xc0] sm:$0xff] %vm180_vm0, %v1202_v0 }
  0x1e   : > { %207 = vst.msk [vmem:[#allocation2 + $0xc8] sm:$0xff] %vm180_vm0, %v1202_v0 }
  0x1f   : > { %209 = vst.msk [vmem:[#allocation2 + $0xd8] sm:$0xff] %vm180_vm0, %v1202_v0 }
  0x20   : > { %210 = vst.msk [vmem:[#allocation2 + $0xe0] sm:$0xff] %vm180_vm0, %v1202_v0 }
  0x21   : > { %212 = vst.msk [vmem:[#allocation2 + $0xf0] sm:$0xff] %vm180_vm0, %v1202_v0 }
  0x22   : > { %213 = vst.msk [vmem:[#allocation2 + $0xf8] sm:$0xff] %vm180_vm0, %v1202_v0 }
  0x23   : > { %215 = vst.msk [vmem:[#allocation2 + $0x108] sm:$0xff] %vm180_vm0, %v1202_v0 }
  0x24   : > { %216 = vst.msk [vmem:[#allocation2 + $0x110] sm:$0xff] %vm180_vm0, %v1202_v0 }
  0x25   : > { %218 = vst.msk [vmem:[#allocation2 + $0x120] sm:$0xff] %vm180_vm0, %v1202_v0 }
  0x26   : > { %219 = vst.msk [vmem:[#allocation2 + $0x128] sm:$0xff] %vm180_vm0, %v1202_v0 }
  0x27   : > { %221 = vst.msk [vmem:[#allocation2 + $0x138] sm:$0xff] %vm180_vm0, %v1202_v0 }
  0x28   : > { %222 = vst.msk [vmem:[#allocation2 + $0x140] sm:$0xff] %vm180_vm0, %v1202_v0 }
  0x29   : > { %224 = vst.msk [vmem:[#allocation2 + $0x150] sm:$0xff] %vm180_vm0, %v1202_v0 }
  0x2a   : > { %225 = vst.msk [vmem:[#allocation2 + $0x158] sm:$0xff] %vm180_vm0, %v1202_v0 }
  0x2b   : > { %227 = vst.msk [vmem:[#allocation2 + $0x168] sm:$0xff] %vm180_vm0, %v1202_v0 }
  0x2c   : > { %228 = vst.msk [vmem:[#allocation2 + $0x170] sm:$0xff] %vm180_vm0, %v1202_v0 }
  0x2d   : > { %230 = vst.msk [vmem:[#allocation2 + $0x180] sm:$0xff] %vm180_vm0, %v1202_v0 }
  0x2e   : > { %231 = vst.msk [vmem:[#allocation2 + $0x188] sm:$0xff] %vm180_vm0, %v1202_v0 }
  0x2f   : > { %233 = vst.msk [vmem:[#allocation2 + $0x198] sm:$0xff] %vm180_vm0, %v1202_v0 }
  0x30   : > { %234 = vst.msk [vmem:[#allocation2 + $0x1a0] sm:$0xff] %vm180_vm0, %v1202_v0 }
  0x31   : > { %184 = vst.msk [vmem:[#allocation2 + $0x10] sm:$0x3] %vm183_vm1, %v1202_v0 }
  0x32   : > { %187 = vst.msk [vmem:[#allocation2 + $0x28] sm:$0x3] %vm183_vm1, %v1202_v0 }
  0x33   : > { %190 = vst.msk [vmem:[#allocation2 + $0x40] sm:$0x3] %vm183_vm1, %v1202_v0 }
  0x34   : > { %193 = vst.msk [vmem:[#allocation2 + $0x58] sm:$0x3] %vm183_vm1, %v1202_v0 }
  0x35   : > { %196 = vst.msk [vmem:[#allocation2 + $0x70] sm:$0x3] %vm183_vm1, %v1202_v0 }
  0x36   : > { %199 = vst.msk [vmem:[#allocation2 + $0x88] sm:$0x3] %vm183_vm1, %v1202_v0 }
  0x37   : > { %202 = vst.msk [vmem:[#allocation2 + $0xa0] sm:$0x3] %vm183_vm1, %v1202_v0 }
  0x38   : > { %205 = vst.msk [vmem:[#allocation2 + $0xb8] sm:$0x3] %vm183_vm1, %v1202_v0  ;;  %v338_v23 = vld [vmem:[#allocation2 + $0x9] sm:$0xff] }
  0x39   : > { %208 = vst.msk [vmem:[#allocation2 + $0xd0] sm:$0x3] %vm183_vm1, %v1202_v0  ;;  %v374_v34 = vadd.f32 %v338_v23, %v302_v22  ;;  %v410_v39 = vld [vmem:[#allocation2 + $0xa] sm:$0xff]  ;;  %v335_v23 = vld [vmem:[#allocation2 + $0x198] sm:$0xff] }
  0x3a   : > { %211 = vst.msk [vmem:[#allocation2 + $0xe8] sm:$0x3] %vm183_vm1, %v1202_v0 }
  0x3b   : > { %214 = vst.msk [vmem:[#allocation2 + $0x100] sm:$0x3] %vm183_vm1, %v1202_v0  ;;  %v446_v59 = vadd.f32 %v410_v39, %v374_v34  ;;  %v174_v34 = vld [vmem:[%s1333_s13 + $0xd0] sm:$0xff]  ;;  %v176_v39 = vld [vmem:[%s1333_s13 + $0xe0] sm:$0xff] }
  0x3c   : > { %217 = vst.msk [vmem:[#allocation2 + $0x118] sm:$0x3] %vm183_vm1, %v1202_v0 }
  0x3d   : > { %220 = vst.msk [vmem:[#allocation2 + $0x130] sm:$0x3] %vm183_vm1, %v1202_v0 }
  0x3e   : > { %223 = vst.msk [vmem:[#allocation2 + $0x148] sm:$0x3] %vm183_vm1, %v1202_v0 }
  0x3f   : > { %226 = vst.msk [vmem:[#allocation2 + $0x160] sm:$0x3] %vm183_vm1, %v1202_v0 }
  0x40   : > { %229 = vst.msk [vmem:[#allocation2 + $0x178] sm:$0x3] %vm183_vm1, %v1202_v0 }
  0x41   : > { %232 = vst.msk [vmem:[#allocation2 + $0x190] sm:$0x3] %vm183_vm1, %v1202_v0 }
  0x42   : > { %235 = vst.msk [vmem:[#allocation2 + $0x1a8] sm:$0x3] %vm183_vm1, %v1202_v0 }
  0x43   : > { %269 = vst.msk [vmem:[#allocation2 + $0x19] sm:$0xff] %vm180_vm0, %v236_v4 }
  0x44   : > { %270 = vst.msk [vmem:[#allocation2 + $0x21] sm:$0xff] %vm180_vm0, %v237_v6 }
  0x45   : > { %271 = vst.msk [vmem:[#allocation2 + $0x31] sm:$0xff] %vm180_vm0, %v238_v8 }
  0x46   : > { %272 = vst.msk [vmem:[#allocation2 + $0x39] sm:$0xff] %vm180_vm0, %v239_v10 }
  0x47   : > { %273 = vst.msk [vmem:[#allocation2 + $0x49] sm:$0xff] %vm180_vm0, %v240_v12  ;;  %v168_v12 = vld [vmem:[%s1333_s13 + $0xa0] sm:$0xff] }
  0x48   : > { %274 = vst.msk [vmem:[#allocation2 + $0x51] sm:$0xff] %vm180_vm0, %v241_v14  ;;  %v254_v14 = vmul.f32 %v166_v50, %v166_v50  ;;  %v260_v50 = vmul.f32 %v172_v32, %v172_v32 }
  0x49   : > { %275 = vst.msk [vmem:[#allocation2 + $0x61] sm:$0xff] %vm180_vm0, %v242_v16 }
  0x4a   : > { %v303_v35 = vld [vmem:[#allocation2 + $0x18] sm:$0xff]  ;;  %276 = vst.msk [vmem:[#allocation2 + $0x69] sm:$0xff] %vm180_vm0, %v243_v20  ;;  %v170_v20 = vld [vmem:[%s1333_s13 + $0xb0] sm:$0xff] }
  0x4b   : > { %v339_v36 = vld [vmem:[#allocation2 + $0x19] sm:$0xff]  ;;  %v340_v42 = vld [vmem:[#allocation2 + $0x21] sm:$0xff]  ;;  %277 = vst.msk [vmem:[#allocation2 + $0x79] sm:$0xff] %vm180_vm0, %v244_v24 }
  0x4c   : > { %v375_v40 = vadd.f32 %v339_v36, %v303_v35  ;;  %v304_v41 = vld [vmem:[#allocation2 + $0x20] sm:$0xff]  ;;  %v305_v47 = vld [vmem:[#allocation2 + $0x30] sm:$0xff]  ;;  %278 = vst.msk [vmem:[#allocation2 + $0x81] sm:$0xff] %vm180_vm0, %v245_v27  ;;  %v256_v27 = vmul.f32 %v168_v12, %v168_v12 }
  0x4d   : > { %v376_v45 = vadd.f32 %v340_v42, %v304_v41  ;;  %v411_v46 = vld [vmem:[#allocation2 + $0x1a] sm:$0xff]  ;;  %v341_v48 = vld [vmem:[#allocation2 + $0x31] sm:$0xff]  ;;  %v412_v52 = vld [vmem:[#allocation2 + $0x22] sm:$0xff]  ;;  %279 = vst.msk [vmem:[#allocation2 + $0x91] sm:$0xff] %vm180_vm0, %v246_v30 }
  0x4e   : > { %v447_v53 = vadd.f32 %v411_v46, %v375_v40  ;;  %v377_v54 = vadd.f32 %v341_v48, %v305_v47  ;;  %v306_v55 = vld [vmem:[#allocation2 + $0x38] sm:$0xff]  ;;  %v307_v63 = vld [vmem:[#allocation2 + $0x48] sm:$0xff]  ;;  %280 = vst.msk [vmem:[#allocation2 + $0x99] sm:$0xff] %vm180_vm0, %v247_v37  ;;  %v258_v37 = vmul.f32 %v170_v20, %v170_v20  ;;  %v336_v47 = vld [vmem:[#allocation2 + $0x1a0] sm:$0xff] }
  0x4f   : > { %v342_v56 = vld [vmem:[#allocation2 + $0x39] sm:$0xff]  ;;  %v448_v60 = vadd.f32 %v412_v52, %v376_v45  ;;  %v343_v0 = vld [vmem:[#allocation2 + $0x49] sm:$0xff]  ;;  %v344_v6 = vld [vmem:[#allocation2 + $0x51] sm:$0xff]  ;;  %281 = vst.msk [vmem:[#allocation2 + $0xa9] sm:$0xff] %vm180_vm0, %v248_v43 }
  0x50   : > { %v378_v61 = vadd.f32 %v342_v56, %v306_v55  ;;  %v413_v62 = vld [vmem:[#allocation2 + $0x32] sm:$0xff]  ;;  %v414_v2 = vld [vmem:[#allocation2 + $0x3a] sm:$0xff]  ;;  %v379_v4 = vadd.f32 %v343_v0, %v307_v63  ;;  %v481_v8 = vadd.f32 %v447_v53, %v445_v51  ;;  %282 = vst.msk [vmem:[#allocation2 + $0xb1] sm:$0xff] %vm180_vm0, %v249_v49  ;;  %v415_v18 = vld [vmem:[#allocation2 + $0x4a] sm:$0xff]  ;;  %v261_v55 = vmul.f32 %v173_v33, %v173_v33 }
  0x51   : > { %v1385_v3 = vadd.f32 %v413_v62, %v377_v54  ;;  %v308_v5 = vld [vmem:[#allocation2 + $0x50] sm:$0xff]  ;;  %v482_v13 = vadd.f32 %v448_v60, %v446_v59  ;;  %283 = vst.msk [vmem:[#allocation2 + $0xc1] sm:$0xff] %vm180_vm0, %v250_v57  ;;  %v371_v24 = vld [vmem:[#allocation2 + $0x199] sm:$0xff]  ;;  %v345_v41 = vld [vmem:[#allocation2 + $0x61] sm:$0xff]  ;;  %v262_v62 = vmul.f32 %v174_v34, %v174_v34 }
  0x52   : > { %v1388_v9 = vadd.f32 %v414_v2, %v378_v61  ;;  %v380_v10 = vadd.f32 %v344_v6, %v308_v5  ;;  %284 = vst.msk [vmem:[#allocation2 + $0xc9] sm:$0xff] %vm180_vm0, %v251_v1  ;;  %v416_v25 = vld [vmem:[#allocation2 + $0x52] sm:$0xff]  ;;  %v1400_v26 = vadd.f32 %v415_v18, %v379_v4  ;;  %v309_v36 = vld [vmem:[#allocation2 + $0x60] sm:$0xff]  ;;  %v310_v42 = vld [vmem:[#allocation2 + $0x68] sm:$0xff]  ;;  %v1425_v52 = vadd.f32 %v371_v24, %v335_v23 }
  0x53   : > { %v513_v16 = vadd.f32 %v481_v8, %v1385_v3  ;;  %v483_v17 = vadd.f32 %v1385_v3, %v447_v53  ;;  %285 = vst.msk [vmem:[#allocation2 + $0xd9] sm:$0xff] %vm180_vm0, %v252_v7  ;;  %v346_v43 = vld [vmem:[#allocation2 + $0x69] sm:$0xff]  ;;  %v311_v48 = vld [vmem:[#allocation2 + $0x78] sm:$0xff]  ;;  %v312_v53 = vld [vmem:[#allocation2 + $0x80] sm:$0xff]  ;;  %v381_v58 = vadd.f32 %v345_v41, %v309_v36  ;;  %v263_v4 = vmul.f32 %v175_v38, %v175_v38 }
  0x54   : > { %v514_v21 = vadd.f32 %v482_v13, %v1388_v9  ;;  %v484_v22 = vadd.f32 %v1388_v9, %v448_v60  ;;  %v1406_v30 = vadd.f32 %v416_v25, %v380_v10  ;;  %286 = vst.msk [vmem:[#allocation2 + $0xe1] sm:$0xff] %vm180_vm0, %v253_v11  ;;  %v177_v45 = vld [vmem:[%s1333_s13 + $0xe8] sm:$0xff]  ;;  %v347_v49 = vld [vmem:[#allocation2 + $0x79] sm:$0xff]  ;;  %v178_v51 = vld [vmem:[%s1333_s13 + $0xf0] sm:$0xff]  ;;  %v382_v59 = vadd.f32 %v346_v43, %v310_v42 }
  0x55   : > { %v1404_v29 = vmul.f32 0.11111111, %v513_v16  ;;  %287 = vst.msk [vmem:[#allocation2 + $0xf1] sm:$0xff] %vm180_vm0, %v254_v14  ;;  %v515_v40 = vadd.f32 %v483_v17, %v1400_v26  ;;  %v348_v54 = vld [vmem:[#allocation2 + $0x81] sm:$0xff]  ;;  %v179_v56 = vld [vmem:[%s1333_s13 + $0xf8] sm:$0xff]  ;;  %v313_v60 = vld [vmem:[#allocation2 + $0x90] sm:$0xff]  ;;  %v383_v0 = vadd.f32 %v347_v49, %v311_v48  ;;  %v264_v5 = vmul.f32 %v176_v39, %v176_v39 }
  0x56   : > { %v1412_v35 = vmul.f32 0.11111111, %v514_v21  ;;  %288 = vst.msk [vmem:[#allocation2 + $0xf9] sm:$0xff] %vm180_vm0, %v255_v19  ;;  %v516_v46 = vadd.f32 %v484_v22, %v1406_v30  ;;  %v372_v57 = vld [vmem:[#allocation2 + $0x1a1] sm:$0xff]  ;;  %v349_v61 = vld [vmem:[#allocation2 + $0x91] sm:$0xff]  ;;  %v350_v2 = vld [vmem:[#allocation2 + $0x99] sm:$0xff]  ;;  %v384_v10 = vadd.f32 %v348_v54, %v312_v53  ;;  %v265_v13 = vmul.f32 %v177_v45, %v177_v45 }
  0x57   : > { %1114 = vrsqrt.f32 %v1404_v29  ;;  %289 = vst.msk [vmem:[#allocation2 + $0x109] sm:$0xff] %vm180_vm0, %v256_v27  ;;  %v1430_v63 = vmul.f32 0.11111111, %v515_v40  ;;  %v314_v1 = vld [vmem:[#allocation2 + $0x98] sm:$0xff]  ;;  %v417_v8 = vld [vmem:[#allocation2 + $0x62] sm:$0xff]  ;;  %v266_v14 = vmul.f32 %v178_v51, %v178_v51  ;;  %v1439_v15 = vadd.f32 %v372_v57, %v336_v47  ;;  %v418_v16 = vld [vmem:[#allocation2 + $0x6a] sm:$0xff] }
  0x58   : > { %1116 = vrsqrt.f32 %v1412_v35  ;;  %290 = vst.msk [vmem:[#allocation2 + $0x111] sm:$0xff] %vm180_vm0, %v257_v31  ;;  %v1433_v6 = vmul.f32 0.11111111, %v516_v46  ;;  %v315_v11 = vld [vmem:[#allocation2 + $0xa8] sm:$0xff]  ;;  %v385_v17 = vadd.f32 %v349_v61, %v313_v60  ;;  %v316_v18 = vld [vmem:[#allocation2 + $0xb0] sm:$0xff]  ;;  %v267_v20 = vmul.f32 %v179_v56, %v179_v56  ;;  %v419_v25 = vld [vmem:[#allocation2 + $0x7a] sm:$0xff] }
  0x59   : > { %291 = vst.msk [vmem:[#allocation2 + $0x121] sm:$0xff] %vm180_vm0, %v258_v37  ;;  %v351_v12 = vld [vmem:[#allocation2 + $0xa9] sm:$0xff]  ;;  %1118 = vrsqrt.f32 %v1430_v63  ;;  %v352_v19 = vld [vmem:[#allocation2 + $0xb1] sm:$0xff]  ;;  %v1446_v23 = vadd.f32 %v417_v8, %v381_v58  ;;  %v1448_v24 = vadd.f32 %v418_v16, %v382_v59  ;;  %v386_v28 = vadd.f32 %v350_v2, %v314_v1  ;;  %v317_v31 = vld [vmem:[#allocation2 + $0xc0] sm:$0xff] }
  0x5a   : > { %292 = vst.msk [vmem:[#allocation2 + $0x129] sm:$0xff] %vm180_vm0, %v259_v44  ;;  %v420_v27 = vld [vmem:[#allocation2 + $0x82] sm:$0xff]  ;;  %1120 = vrsqrt.f32 %v1433_v6  ;;  %v1452_v32 = vadd.f32 %v419_v25, %v383_v0  ;;  %v387_v33 = vadd.f32 %v351_v12, %v315_v11  ;;  %v421_v41 = vld [vmem:[#allocation2 + $0x92] sm:$0xff]  ;;  %v388_v42 = vadd.f32 %v352_v19, %v316_v18  ;;  %v422_v46 = vld [vmem:[#allocation2 + $0x9a] sm:$0xff] }
  0x5b   : > { %293 = vst.msk [vmem:[#allocation2 + $0x139] sm:$0xff] %vm180_vm0, %v260_v50  ;;  %v353_v34 = vld [vmem:[#allocation2 + $0xc1] sm:$0xff]  ;;  %v354_v37 = vld [vmem:[#allocation2 + $0xc9] sm:$0xff]  ;;  %v1458_v40 = vadd.f32 %v420_v27, %v384_v10  ;;  %v319_v43 = vld [vmem:[#allocation2 + $0xd8] sm:$0xff]  ;;  %vm584_vm2 = vcmp.eq.f32.partialorder %v1404_v29, inf  ;;  %v485_v45 = vadd.f32 %v1400_v26, %v1385_v3  ;;  %v1464_v47 = vadd.f32 %v421_v41, %v385_v17 }
  0x5c   : > { %294 = vst.msk [vmem:[#allocation2 + $0x141] sm:$0xff] %vm180_vm0, %v261_v55  ;;  %v318_v36 = vld [vmem:[#allocation2 + $0xc8] sm:$0xff]  ;;  %v355_v44 = vld [vmem:[#allocation2 + $0xd9] sm:$0xff]  ;;  %vm586_vm3 = vcmp.eq.f32.partialorder %v1404_v29, 0.0  ;;  %v587_v51 = vand.u32 2147483648, %v1404_v29  ;;  %v1472_v55 = vadd.f32 %v422_v46, %v386_v28  ;;  %v389_v56 = vadd.f32 %v353_v34, %v317_v31  ;;  %v321_v58 = vld [vmem:[#allocation2 + $0xf0] sm:$0xff] }
  0x5d   : > { %v1435_v7 = vpop.eup %1114  ;;  %295 = vst.msk [vmem:[#allocation2 + $0x151] sm:$0xff] %vm180_vm0, %v262_v62  ;;  %v423_v48 = vld [vmem:[#allocation2 + $0xaa] sm:$0xff]  ;;  %v320_v49 = vld [vmem:[#allocation2 + $0xe0] sm:$0xff]  ;;  %v390_v3 = vadd.f32 %v354_v37, %v318_v36  ;;  %vm596_vm4 = vcmp.eq.f32.partialorder %v1412_v35, inf  ;;  %v599_v60 = vand.u32 2147483648, %v1412_v35  ;;  %v424_v61 = vld [vmem:[#allocation2 + $0xb2] sm:$0xff]  ;;  %v391_v0 = vadd.f32 %v355_v44, %v319_v43 }
  0x5e   : > { %v578_v21 = vmul.f32 %v1435_v7, %v1404_v29  ;;  %v1444_v22 = vpop.eup %1116  ;;  %296 = vst.msk [vmem:[#allocation2 + $0x159] sm:$0xff] %vm180_vm0, %v263_v4  ;;  %v356_v57 = vld [vmem:[#allocation2 + $0xe1] sm:$0xff]  ;;  %v357_v59 = vld [vmem:[#allocation2 + $0xf1] sm:$0xff]  ;;  %v1477_v62 = vadd.f32 %v423_v48, %v387_v33  ;;  %vm598_vm5 = vcmp.eq.f32.partialorder %v1412_v35, 0.0  ;;  %v358_v10 = vld [vmem:[#allocation2 + $0xf9] sm:$0xff]  ;;  %v517_v12 = vadd.f32 %v485_v45, %v1446_v23 }
  0x5f   : > { %v590_v39 = vmul.f32 %v1444_v22, %v1412_v35  ;;  %297 = vst.msk [vmem:[#allocation2 + $0x169] sm:$0xff] %vm180_vm0, %v264_v5  ;;  %v1470_v54 = vpop.eup %1118  ;;  %v1483_v5 = vadd.f32 %v424_v61, %v388_v42  ;;  %v322_v8 = vld [vmem:[#allocation2 + $0xf8] sm:$0xff]  ;;  %v426_v16 = vld [vmem:[#allocation2 + $0xca] sm:$0xff]  ;;  %v392_v17 = vadd.f32 %v356_v57, %v320_v49  ;;  %v393_v18 = vadd.f32 %v357_v59, %v321_v58 }
  0x60   : > { %v579_v38 = vmul.f32 %v1435_v7, %v578_v21  ;;  %298 = vst.msk [vmem:[#allocation2 + $0x171] sm:$0xff] %vm180_vm0, %v265_v13  ;;  %v1481_v4 = vpop.eup %1120  ;;  %v602_v11 = vmul.f32 %v1470_v54, %v1430_v63  ;;  %v486_v13 = vadd.f32 %v1406_v30, %v1388_v9  ;;  %v1493_v25 = vadd.f32 %v426_v16, %v390_v3  ;;  %v427_v27 = vld [vmem:[#allocation2 + $0xda] sm:$0xff]  ;;  %v323_v34 = vld [vmem:[#allocation2 + $0x108] sm:$0xff]  ;;  %v324_v46 = vld [vmem:[#allocation2 + $0x110] sm:$0xff] }
  0x61   : > { %v591_v53 = vmul.f32 %v1444_v22, %v590_v39  ;;  %299 = vst.msk [vmem:[#allocation2 + $0x181] sm:$0xff] %vm180_vm0, %v266_v14  ;;  %v425_v14 = vld [vmem:[#allocation2 + $0xc2] sm:$0xff]  ;;  %v614_v31 = vmul.f32 %v1481_v4, %v1433_v6  ;;  %v1498_v33 = vadd.f32 %v427_v27, %v391_v0  ;;  %v394_v9 = vadd.f32 %v358_v10, %v322_v8  ;;  %v429_v39 = vld [vmem:[#allocation2 + $0xf2] sm:$0xff] }
  0x62   : > { %v580_v50 = vmul.f32 0.5, %v579_v38  ;;  %300 = vst.msk [vmem:[#allocation2 + $0x189] sm:$0xff] %vm180_vm0, %v267_v20  ;;  %v1491_v21 = vadd.f32 %v425_v14, %v389_v56  ;;  %v603_v28 = vmul.f32 %v1470_v54, %v602_v11  ;;  %v359_v36 = vld [vmem:[#allocation2 + $0x109] sm:$0xff]  ;;  %vm608_vm6 = vcmp.eq.f32.partialorder %v1430_v63, inf  ;;  %v360_v48 = vld [vmem:[#allocation2 + $0x111] sm:$0xff]  ;;  %v325_v3 = vld [vmem:[#allocation2 + $0x120] sm:$0xff] }
  0x63   : > { %v592_v2 = vmul.f32 0.5, %v591_v53  ;;  %v428_v38 = vld [vmem:[#allocation2 + $0xe2] sm:$0xff]  ;;  %vm610_vm7 = vcmp.eq.f32.partialorder %v1430_v63, 0.0  ;;  %v611_v42 = vand.u32 2147483648, %v1430_v63  ;;  %v615_v43 = vmul.f32 %v1481_v4, %v614_v31  ;;  %v430_v53 = vld [vmem:[#allocation2 + $0xfa] sm:$0xff] }
  0x64   : > { %v581_v1 = vsub.f32 1.5, %v580_v50  ;;  %v604_v41 = vmul.f32 0.5, %v603_v28  ;;  %v1513_v44 = vmul.f32 0.11111111, %v517_v12  ;;  %v1517_v45 = vadd.f32 %v429_v39, %v393_v18  ;;  %v361_v57 = vld [vmem:[#allocation2 + $0x121] sm:$0xff]  ;;  %v362_v10 = vld [vmem:[#allocation2 + $0x129] sm:$0xff] }
  0x65   : > { %v593_v20 = vsub.f32 1.5, %v592_v2  ;;  %v395_v56 = vadd.f32 %v359_v36, %v323_v34  ;;  %vm620_vm8 = vcmp.eq.f32.partialorder %v1433_v6, inf  ;;  %v1528_v61 = vadd.f32 %v430_v53, %v394_v9  ;;  %v326_v8 = vld [vmem:[#allocation2 + $0x128] sm:$0xff]  ;;  %v363_v18 = vld [vmem:[#allocation2 + $0x139] sm:$0xff]  ;;  %v329_v31 = vld [vmem:[#allocation2 + $0x150] sm:$0xff] }
  0x66   : > { %v582_v19 = vmul.f32 %v1435_v7, %v581_v1  ;;  %v605_v59 = vsub.f32 1.5, %v604_v41  ;;  %v616_v1 = vmul.f32 0.5, %v615_v43  ;;  %vm622_vm9 = vcmp.eq.f32.partialorder %v1433_v6, 0.0  ;;  %v364_v28 = vld [vmem:[#allocation2 + $0x141] sm:$0xff]  ;;  %v365_v9 = vld [vmem:[#allocation2 + $0x151] sm:$0xff] }
  0x67   : > { %v594_v7 = vmul.f32 %v1444_v22, %v593_v20  ;;  %v1515_v22 = vadd.f32 %v428_v38, %v392_v17  ;;  %v396_v2 = vadd.f32 %v360_v48, %v324_v46  ;;  %1122 = vrsqrt.f32 %v1513_v44  ;;  %v327_v17 = vld [vmem:[#allocation2 + $0x138] sm:$0xff]  ;;  %v431_v48 = vld [vmem:[#allocation2 + $0x10a] sm:$0xff] }
  0x68   : > { %v583_v37 = vmul.f32 %v582_v19, %v1404_v29  ;;  %v397_v11 = vadd.f32 %v361_v57, %v325_v3  ;;  %v617_v12 = vsub.f32 1.5, %v616_v1  ;;  %v623_v14 = vand.u32 2147483648, %v1433_v6  ;;  %v328_v19 = vld [vmem:[#allocation2 + $0x140] sm:$0xff] }
  0x69   : > { %v595_v50 = vmul.f32 %v594_v7, %v1412_v35  ;;  %v518_v16 = vadd.f32 %v486_v13, %v1448_v24  ;;  %v398_v27 = vadd.f32 %v362_v10, %v326_v8  ;;  %v490_v36 = vadd.f32 %v1458_v40, %v1448_v24  ;;  %v433_v57 = vld [vmem:[#allocation2 + $0x122] sm:$0xff]  ;;  %v434_v10 = vld [vmem:[#allocation2 + $0x12a] sm:$0xff] }
  0x6a   : > { %v585_v49 = vsel %vm584_vm2, %v1404_v29, %v583_v37  ;;  %v618_v13 = vmul.f32 %v1481_v4, %v617_v12  ;;  %v399_v7 = vadd.f32 %v363_v18, %v327_v17  ;;  %v401_v41 = vadd.f32 %v365_v9, %v329_v31  ;;  %v436_v12 = vld [vmem:[#allocation2 + $0x142] sm:$0xff]  ;;  %v437_v17 = vld [vmem:[#allocation2 + $0x152] sm:$0xff] }
  0x6b   : > { %v588_v58 = vsel %vm586_vm3, %v587_v51, %v585_v49  ;;  %v597_v0 = vsel %vm596_vm4, %v1412_v35, %v595_v50  ;;  %v606_v51 = vmul.f32 %v1470_v54, %v605_v59  ;;  %v487_v35 = vadd.f32 %v1446_v23, %v1400_v26  ;;  %v432_v49 = vld [vmem:[#allocation2 + $0x112] sm:$0xff] }
  0x6c   : > { %961 = vst.msk [vmem:[%s1508_s16] sm:$0xff] %vm180_vm0, %v588_v58  ;;  %v600_v29 = vsel %vm598_vm5, %v599_v60, %v597_v0  ;;  %v488_v54 = vadd.f32 %v1448_v24, %v1406_v30  ;;  %v489_v60 = vadd.f32 %v1452_v32, %v1446_v23  ;;  %v1554_v34 = vmul.f32 0.11111111, %v518_v16  ;;  %v330_v58 = vld [vmem:[#allocation2 + $0x158] sm:$0xff] }
  0x6d   : > { %962 = vst.msk [vmem:[%s1508_s16 + $0x8] sm:$0xff] %vm180_vm0, %v600_v29  ;;  %v607_v20 = vmul.f32 %v606_v51, %v1430_v63  ;;  %v519_v30 = vadd.f32 %v487_v35, %v1452_v32  ;;  %v619_v4 = vmul.f32 %v618_v13, %v1433_v6  ;;  %v1123_v39 = vpop.eup %1122  ;;  %v400_v24 = vadd.f32 %v364_v28, %v328_v19  ;;  %v366_v59 = vld [vmem:[#allocation2 + $0x159] sm:$0xff] }
  0x6e   : > { %v520_v23 = vadd.f32 %v488_v54, %v1458_v40  ;;  %v521_v37 = vadd.f32 %v489_v60, %v1464_v47  ;;  %1124 = vrsqrt.f32 %v1554_v34  ;;  %v522_v46 = vadd.f32 %v490_v36, %v1472_v55  ;;  %v435_v51 = vld [vmem:[#allocation2 + $0x13a] sm:$0xff] }
  0x6f   : > { %v609_v26 = vsel %vm608_vm6, %v1430_v63, %v607_v20  ;;  %v1570_v43 = vmul.f32 0.11111111, %v519_v30  ;;  %v621_v63 = vsel %vm620_vm8, %v1433_v6, %v619_v4  ;;  %v1581_v3 = vadd.f32 %v431_v48, %v395_v56 }
  0x70   : > { %v612_v38 = vsel %vm610_vm7, %v611_v42, %v609_v26  ;;  %v626_v42 = vmul.f32 %v1123_v39, %v1513_v44  ;;  %v1577_v50 = vmul.f32 0.11111111, %v520_v23  ;;  %v1579_v53 = vmul.f32 0.11111111, %v521_v37 }
  0x71   : > { %963 = vst.msk [vmem:[%s1508_s16 + $0x10] sm:$0xff] %vm180_vm0, %v612_v38  ;;  %v624_v0 = vsel %vm622_vm9, %v623_v14, %v621_v63  ;;  %1126 = vrsqrt.f32 %v1570_v43  ;;  %v491_v1 = vadd.f32 %v1464_v47, %v1452_v32  ;;  %v1588_v8 = vadd.f32 %v432_v49, %v396_v2 }
  0x72   : > { %v1590_v29 = vadd.f32 %v433_v57, %v397_v11  ;;  %964 = vst.msk [vmem:[%s1508_s16 + $0x18] sm:$0xff] %vm180_vm0, %v624_v0  ;;  %v627_v56 = vmul.f32 %v1123_v39, %v626_v42  ;;  %1128 = vrsqrt.f32 %v1577_v50  ;;  %v1595_v16 = vadd.f32 %v434_v10, %v398_v27 }
  0x73   : > { %v1597_v6 = vadd.f32 %v435_v51, %v399_v7  ;;  %v1599_v14 = vadd.f32 %v436_v12, %v400_v24  ;;  %1130 = vrsqrt.f32 %v1579_v53  ;;  %v1602_v2 = vadd.f32 %v366_v59, %v330_v58 }
  0x74   : > { %v1125_v32 = vpop.eup %1124  ;;  %v1604_v11 = vadd.f32 %v437_v17, %v401_v41  ;;  %v628_v18 = vmul.f32 0.5, %v627_v56  ;;  %v1606_v19 = vmul.f32 0.11111111, %v522_v46  ;;  %v523_v35 = vadd.f32 %v491_v1, %v1477_v62 }
  0x75   : > { %v638_v20 = vmul.f32 %v1125_v32, %v1554_v34  ;;  %v492_v54 = vadd.f32 %v1472_v55, %v1458_v40  ;;  %v493_v60 = vadd.f32 %v1477_v62, %v1464_v47  ;;  %vm632_vm10 = vcmp.eq.f32.partialorder %v1513_v44, inf }
  0x76   : > { %v629_v27 = vsub.f32 1.5, %v628_v18  ;;  %vm634_vm11 = vcmp.eq.f32.partialorder %v1513_v44, 0.0  ;;  %1132 = vrsqrt.f32 %v1606_v19  ;;  %v635_v31 = vand.u32 2147483648, %v1513_v44 }
  0x77   : > { %v1127_v28 = vpop.eup %1126  ;;  %v639_v9 = vmul.f32 %v1125_v32, %v638_v20  ;;  %v1618_v13 = vmul.f32 0.11111111, %v523_v35  ;;  %v524_v36 = vadd.f32 %v492_v54, %v1483_v5  ;;  %vm644_vm12 = vcmp.eq.f32.partialorder %v1554_v34, inf }
  0x78   : > { %v1129_v26 = vpop.eup %1128  ;;  %v630_v40 = vmul.f32 %v1123_v39, %v629_v27  ;;  %v650_v47 = vmul.f32 %v1127_v28, %v1570_v43  ;;  %v525_v30 = vadd.f32 %v493_v60, %v1491_v21  ;;  %vm646_vm13 = vcmp.eq.f32.partialorder %v1554_v34, 0.0 }
  0x79   : > { %v1131_v23 = vpop.eup %1130  ;;  %v640_v37 = vmul.f32 0.5, %v639_v9  ;;  %v647_v7 = vand.u32 2147483648, %v1554_v34  ;;  %v662_v38 = vmul.f32 %v1129_v26, %v1577_v50  ;;  %1134 = vrsqrt.f32 %v1618_v13 }
  0x7a   : > { %v631_v4 = vmul.f32 %v630_v40, %v1513_v44  ;;  %v651_v24 = vmul.f32 %v1127_v28, %v650_v47  ;;  %v659_v39 = vand.u32 2147483648, %v1570_v43  ;;  %v674_v41 = vmul.f32 %v1131_v23, %v1579_v53 }
  0x7b   : > { %v641_v46 = vsub.f32 1.5, %v640_v37  ;;  %vm656_vm14 = vcmp.eq.f32.partialorder %v1570_v43, inf  ;;  %v663_v48 = vmul.f32 %v1129_v26, %v662_v38  ;;  %v671_v49 = vand.u32 2147483648, %v1577_v50 }
  0x7c   : > { %v1633_v63 = vmul.f32 0.11111111, %v524_v36  ;;  %v1133_v42 = vpop.eup %1132  ;;  %v633_v57 = vsel %vm632_vm10, %v1513_v44, %v631_v4  ;;  %v652_v58 = vmul.f32 0.5, %v651_v24  ;;  %vm658_vm15 = vcmp.eq.f32.partialorder %v1570_v43, 0.0 }
  0x7d   : > { %vm668_vm1 = vcmp.eq.f32.partialorder %v1577_v50, inf  ;;  %v675_v59 = vmul.f32 %v1131_v23, %v674_v41  ;;  %v1640_v0 = vmul.f32 0.11111111, %v525_v30  ;;  %v636_v1 = vsel %vm634_vm11, %v635_v31, %v633_v57 }
  0x7e   : > { %v642_v10 = vmul.f32 %v1125_v32, %v641_v46  ;;  %v664_v51 = vmul.f32 0.5, %v663_v48  ;;  %vm670_vm2 = vcmp.eq.f32.partialorder %v1577_v50, 0.0  ;;  %vm680_vm3 = vcmp.eq.f32.partialorder %v1579_v53, inf  ;;  %965 = vst.msk [vmem:[%s1508_s16 + $0x20] sm:$0xff] %vm180_vm0, %v636_v1 }
  0x7f   : > { %v686_v12 = vmul.f32 %v1133_v42, %v1606_v19  ;;  %v653_v56 = vsub.f32 1.5, %v652_v58  ;;  %v676_v17 = vmul.f32 0.5, %v675_v59  ;;  %vm682_vm4 = vcmp.eq.f32.partialorder %v1579_v53, 0.0  ;;  %v1135_v18 = vpop.eup %1134 }
  0x80   : > { %1136 = vrsqrt.f32 %v1633_v63  ;;  %v643_v44 = vmul.f32 %v642_v10, %v1554_v34  ;;  %v665_v32 = vsub.f32 1.5, %v664_v51  ;;  %v683_v20 = vand.u32 2147483648, %v1579_v53 }
  0x81   : > { %v687_v35 = vmul.f32 %v1133_v42, %v686_v12  ;;  %v654_v54 = vmul.f32 %v1127_v28, %v653_v56  ;;  %v677_v60 = vsub.f32 1.5, %v676_v17  ;;  %v698_v27 = vmul.f32 %v1135_v18, %v1618_v13 }
  0x82   : > { %v494_v31 = vadd.f32 %v1483_v5, %v1472_v55  ;;  %v645_v9 = vsel %vm644_vm12, %v1554_v34, %v643_v44  ;;  %v666_v36 = vmul.f32 %v1129_v26, %v665_v32  ;;  %1138 = vrsqrt.f32 %v1640_v0  ;;  %v331_v32 = vld [vmem:[#allocation2 + $0x168] sm:$0xff] }
  0x83   : > { %v688_v40 = vmul.f32 0.5, %v687_v35  ;;  %v648_v47 = vsel %vm646_vm13, %v647_v7, %v645_v9  ;;  %v655_v30 = vmul.f32 %v654_v54, %v1570_v43  ;;  %v678_v28 = vmul.f32 %v1131_v23, %v677_v60 }
  0x84   : > { %v699_v37 = vmul.f32 %v1135_v18, %v698_v27  ;;  %966 = vst.msk [vmem:[%s1508_s16 + $0x28] sm:$0xff] %vm180_vm0, %v648_v47  ;;  %v667_v55 = vmul.f32 %v666_v36, %v1577_v50  ;;  %vm692_vm5 = vcmp.eq.f32.partialorder %v1606_v19, inf  ;;  %vm694_vm6 = vcmp.eq.f32.partialorder %v1606_v19, 0.0 }
  0x85   : > { %v689_v38 = vsub.f32 1.5, %v688_v40  ;;  %v657_v34 = vsel %vm656_vm14, %v1570_v43, %v655_v30  ;;  %v679_v7 = vmul.f32 %v678_v28, %v1579_v53  ;;  %v695_v23 = vand.u32 2147483648, %v1606_v19  ;;  %v332_v28 = vld [vmem:[#allocation2 + $0x170] sm:$0xff] }
  0x86   : > { %v1137_v26 = vpop.eup %1136  ;;  %v700_v4 = vmul.f32 0.5, %v699_v37  ;;  %v660_v24 = vsel %vm658_vm15, %v659_v39, %v657_v34  ;;  %v669_v41 = vsel %vm668_vm1, %v1577_v50, %v667_v55  ;;  %v526_v43 = vadd.f32 %v494_v31, %v1493_v25 }
  0x87   : > { %v690_v46 = vmul.f32 %v1133_v42, %v689_v38  ;;  %v710_v48 = vmul.f32 %v1137_v26, %v1633_v63  ;;  %967 = vst.msk [vmem:[%s1508_s16 + $0x30] sm:$0xff] %vm180_vm0, %v660_v24  ;;  %v672_v57 = vsel %vm670_vm2, %v671_v49, %v669_v41  ;;  %v681_v58 = vsel %vm680_vm3, %v1579_v53, %v679_v7  ;;  %v438_v24 = vld [vmem:[#allocation2 + $0x15a] sm:$0xff] }
  0x88   : > { %v701_v59 = vsub.f32 1.5, %v700_v4  ;;  %v1139_v39 = vpop.eup %1138  ;;  %968 = vst.msk [vmem:[%s1508_s16 + $0x38] sm:$0xff] %vm180_vm0, %v672_v57  ;;  %v684_v42 = vsel %vm682_vm4, %v683_v20, %v681_v58  ;;  %v495_v50 = vadd.f32 %v1491_v21, %v1477_v62  ;;  %v1697_v12 = vmul.f32 0.11111111, %v526_v43 }
  0x89   : > { %v691_v1 = vmul.f32 %v690_v46, %v1606_v19  ;;  %v711_v10 = vmul.f32 %v1137_v26, %v710_v48  ;;  %969 = vst.msk [vmem:[%s1508_s16 + $0x40] sm:$0xff] %vm180_vm0, %v684_v42  ;;  %v722_v51 = vmul.f32 %v1139_v39, %v1640_v0  ;;  %v496_v56 = vadd.f32 %v1493_v25, %v1483_v5  ;;  %v367_v5 = vld [vmem:[#allocation2 + $0x169] sm:$0xff] }
  0x8a   : > { %v702_v49 = vmul.f32 %v1135_v18, %v701_v59  ;;  %v527_v44 = vadd.f32 %v495_v50, %v1498_v33  ;;  %v497_v62 = vadd.f32 %v1498_v33, %v1491_v21  ;;  %1140 = vrsqrt.f32 %v1697_v12  ;;  %v439_v50 = vld [vmem:[#allocation2 + $0x16a] sm:$0xff] }
  0x8b   : > { %v693_v53 = vsel %vm692_vm5, %v1606_v19, %v691_v1  ;;  %v712_v17 = vmul.f32 0.5, %v711_v10  ;;  %v723_v35 = vmul.f32 %v1139_v39, %v722_v51  ;;  %vm704_vm7 = vcmp.eq.f32.partialorder %v1618_v13, inf }
  0x8c   : > { %v696_v18 = vsel %vm694_vm6, %v695_v23, %v693_v53  ;;  %v703_v20 = vmul.f32 %v702_v49, %v1618_v13  ;;  %vm706_vm8 = vcmp.eq.f32.partialorder %v1618_v13, 0.0  ;;  %v707_v54 = vand.u32 2147483648, %v1618_v13 }
  0x8d   : > { %970 = vst.msk [vmem:[%s1508_s16 + $0x48] sm:$0xff] %vm180_vm0, %v696_v18  ;;  %v713_v21 = vsub.f32 1.5, %v712_v17  ;;  %v724_v19 = vmul.f32 0.5, %v723_v35  ;;  %v1717_v27 = vmul.f32 0.11111111, %v527_v44  ;;  %v528_v31 = vadd.f32 %v496_v56, %v1515_v22 }
  0x8e   : > { %v705_v60 = vsel %vm704_vm7, %v1618_v13, %v703_v20  ;;  %v529_v40 = vadd.f32 %v497_v62, %v1517_v45  ;;  %v498_v47 = vadd.f32 %v1515_v22, %v1493_v25  ;;  %v403_v30 = vadd.f32 %v367_v5, %v331_v32  ;;  %v368_v13 = vld [vmem:[#allocation2 + $0x171] sm:$0xff] }
  0x8f   : > { %v708_v9 = vsel %vm706_vm8, %v707_v54, %v705_v60  ;;  %v714_v36 = vmul.f32 %v1137_v26, %v713_v21  ;;  %vm716_vm9 = vcmp.eq.f32.partialorder %v1633_v63, inf  ;;  %v725_v37 = vsub.f32 1.5, %v724_v19 }
  0x90   : > { %971 = vst.msk [vmem:[%s1508_s16 + $0x50] sm:$0xff] %vm180_vm0, %v708_v9  ;;  %1142 = vrsqrt.f32 %v1717_v27  ;;  %vm718_vm10 = vcmp.eq.f32.partialorder %v1633_v63, 0.0  ;;  %v1729_v38 = vmul.f32 0.11111111, %v528_v31  ;;  %v1731_v26 = vmul.f32 0.11111111, %v529_v40  ;;  %v1141_v34 = vpop.eup %1140 }
  0x91   : > { %v715_v55 = vmul.f32 %v714_v36, %v1633_v63  ;;  %v719_v25 = vand.u32 2147483648, %v1633_v63  ;;  %v726_v7 = vmul.f32 %v1139_v39, %v725_v37  ;;  %v530_v23 = vadd.f32 %v498_v47, %v1528_v61  ;;  %v333_v39 = vld [vmem:[#allocation2 + $0x180] sm:$0xff] }
  0x92   : > { %v499_v4 = vadd.f32 %v1517_v45, %v1498_v33  ;;  %v734_v46 = vmul.f32 %v1141_v34, %v1697_v12  ;;  %1144 = vrsqrt.f32 %v1729_v38  ;;  %v500_v48 = vadd.f32 %v1528_v61, %v1515_v22  ;;  %v369_v33 = vld [vmem:[#allocation2 + $0x181] sm:$0xff] }
  0x93   : > { %v717_v41 = vsel %vm716_vm9, %v1633_v63, %v715_v55  ;;  %v1743_v57 = vadd.f32 %v438_v24, %v1602_v2  ;;  %v1745_v58 = vadd.f32 %v368_v13, %v332_v28  ;;  %v727_v43 = vmul.f32 %v726_v7, %v1640_v0 }
  0x94   : > { %v720_v59 = vsel %vm718_vm10, %v719_v25, %v717_v41  ;;  %vm728_vm11 = vcmp.eq.f32.partialorder %v1640_v0, inf  ;;  %v731_v63 = vand.u32 2147483648, %v1640_v0  ;;  %v735_v42 = vmul.f32 %v1141_v34, %v734_v46 }
  0x95   : > { %972 = vst.msk [vmem:[%s1508_s16 + $0x58] sm:$0xff] %vm180_vm0, %v720_v59  ;;  %1146 = vrsqrt.f32 %v1731_v26  ;;  %v729_v2 = vsel %vm728_vm11, %v1640_v0, %v727_v43  ;;  %vm730_vm12 = vcmp.eq.f32.partialorder %v1640_v0, 0.0  ;;  %v1755_v1 = vmul.f32 0.11111111, %v530_v23 }
  0x96   : > { %v1143_v22 = vpop.eup %1142  ;;  %v531_v10 = vadd.f32 %v499_v4, %v1581_v3  ;;  %v732_v49 = vsel %vm730_vm12, %v731_v63, %v729_v2  ;;  %v736_v51 = vmul.f32 0.5, %v735_v42  ;;  %v532_v53 = vadd.f32 %v500_v48, %v1588_v8 }
  0x97   : > { %v746_v56 = vmul.f32 %v1143_v22, %v1717_v27  ;;  %v1760_v17 = vadd.f32 %v439_v50, %v403_v30  ;;  %v1762_v44 = vadd.f32 %v369_v33, %v333_v39  ;;  %973 = vst.msk [vmem:[%s1508_s16 + $0x60] sm:$0xff] %vm180_vm0, %v732_v49  ;;  %vm740_vm13 = vcmp.eq.f32.partialorder %v1697_v12, inf }
  0x98   : > { %1148 = vrsqrt.f32 %v1755_v1  ;;  %v1145_v0 = vpop.eup %1144  ;;  %v737_v62 = vsub.f32 1.5, %v736_v51  ;;  %v1768_v18 = vmul.f32 0.11111111, %v531_v10  ;;  %v1770_v20 = vmul.f32 0.11111111, %v532_v53 }
  0x99   : > { %v747_v32 = vmul.f32 %v1143_v22, %v746_v56  ;;  %vm742_vm14 = vcmp.eq.f32.partialorder %v1697_v12, 0.0  ;;  %v743_v35 = vand.u32 2147483648, %v1697_v12  ;;  %vm752_vm15 = vcmp.eq.f32.partialorder %v1717_v27, inf }
  0x9a   : > { %v758_v5 = vmul.f32 %v1145_v0, %v1729_v38  ;;  %v738_v21 = vmul.f32 %v1141_v34, %v737_v62  ;;  %vm754_vm1 = vcmp.eq.f32.partialorder %v1717_v27, 0.0  ;;  %1150 = vrsqrt.f32 %v1768_v18 }
  0x9b   : > { %v1147_v54 = vpop.eup %1146  ;;  %v748_v60 = vmul.f32 0.5, %v747_v32  ;;  %v501_v19 = vadd.f32 %v1581_v3, %v1517_v45  ;;  %v755_v31 = vand.u32 2147483648, %v1717_v27  ;;  %v502_v40 = vadd.f32 %v1588_v8, %v1528_v61 }
  0x9c   : > { %v759_v9 = vmul.f32 %v1145_v0, %v758_v5  ;;  %v770_v36 = vmul.f32 %v1147_v54, %v1731_v26  ;;  %v739_v47 = vmul.f32 %v738_v21, %v1697_v12  ;;  %vm764_vm2 = vcmp.eq.f32.partialorder %v1729_v38, inf }
  0x9d   : > { %v749_v30 = vsub.f32 1.5, %v748_v60  ;;  %1152 = vrsqrt.f32 %v1770_v20  ;;  %vm766_vm3 = vcmp.eq.f32.partialorder %v1729_v38, 0.0  ;;  %v767_v45 = vand.u32 2147483648, %v1729_v38 }
  0x9e   : > { %v1149_v28 = vpop.eup %1148  ;;  %v760_v37 = vmul.f32 0.5, %v759_v9  ;;  %v771_v13 = vmul.f32 %v1147_v54, %v770_v36  ;;  %v779_v55 = vand.u32 2147483648, %v1731_v26  ;;  %v741_v61 = vsel %vm740_vm13, %v1697_v12, %v739_v47 }
  0x9f   : > { %v750_v34 = vmul.f32 %v1143_v22, %v749_v30  ;;  %vm776_vm4 = vcmp.eq.f32.partialorder %v1731_v26, inf  ;;  %v782_v25 = vmul.f32 %v1149_v28, %v1755_v1  ;;  %v533_v7 = vadd.f32 %v501_v19, %v1590_v29 }
  0xa0   : > { %v744_v23 = vsel %vm742_vm14, %v743_v35, %v741_v61  ;;  %v761_v4 = vsub.f32 1.5, %v760_v37  ;;  %v772_v24 = vmul.f32 0.5, %v771_v13  ;;  %vm778_vm5 = vcmp.eq.f32.partialorder %v1731_v26, 0.0  ;;  %v1151_v46 = vpop.eup %1150 }
  0xa1   : > { %v534_v41 = vadd.f32 %v502_v40, %v1595_v16  ;;  %974 = vst.msk [vmem:[%s1508_s16 + $0x68] sm:$0xff] %vm180_vm0, %v744_v23  ;;  %v751_v48 = vmul.f32 %v750_v34, %v1717_v27  ;;  %v783_v59 = vmul.f32 %v1149_v28, %v782_v25  ;;  %v1803_v43 = vmul.f32 0.11111111, %v533_v7 }
  0xa2   : > { %v503_v39 = vadd.f32 %v1590_v29, %v1581_v3  ;;  %v762_v12 = vmul.f32 %v1145_v0, %v761_v4  ;;  %v773_v33 = vsub.f32 1.5, %v772_v24  ;;  %v794_v63 = vmul.f32 %v1151_v46, %v1768_v18 }
  0xa3   : > { %v1808_v42 = vmul.f32 0.11111111, %v534_v41  ;;  %v1153_v22 = vpop.eup %1152  ;;  %v753_v2 = vsel %vm752_vm15, %v1717_v27, %v751_v48  ;;  %v784_v10 = vmul.f32 0.5, %v783_v59  ;;  %vm788_vm6 = vcmp.eq.f32.partialorder %v1755_v1, inf  ;;  %v334_v41 = vld [vmem:[#allocation2 + $0x188] sm:$0xff] }
  0xa4   : > { %1154 = vrsqrt.f32 %v1803_v43  ;;  %v756_v50 = vsel %vm754_vm1, %v755_v31, %v753_v2  ;;  %v763_v3 = vmul.f32 %v762_v12, %v1729_v38  ;;  %v774_v49 = vmul.f32 %v1147_v54, %v773_v33  ;;  %v370_v12 = vld [vmem:[#allocation2 + $0x189] sm:$0xff] }
  0xa5   : > { %v795_v51 = vmul.f32 %v1151_v46, %v794_v63  ;;  %975 = vst.msk [vmem:[%s1508_s16 + $0x70] sm:$0xff] %vm180_vm0, %v756_v50  ;;  %v785_v56 = vsub.f32 1.5, %v784_v10  ;;  %vm790_vm7 = vcmp.eq.f32.partialorder %v1755_v1, 0.0  ;;  %v806_v53 = vmul.f32 %v1153_v22, %v1770_v20  ;;  %v440_v10 = vld [vmem:[#allocation2 + $0x172] sm:$0xff] }
  0xa6   : > { %v535_v0 = vadd.f32 %v503_v39, %v1597_v6  ;;  %v765_v62 = vsel %vm764_vm2, %v1729_v38, %v763_v3  ;;  %v775_v27 = vmul.f32 %v774_v49, %v1731_v26  ;;  %1156 = vrsqrt.f32 %v1808_v42 }
  0xa7   : > { %v796_v32 = vmul.f32 0.5, %v795_v51  ;;  %v768_v35 = vsel %vm766_vm3, %v767_v45, %v765_v62  ;;  %v786_v5 = vmul.f32 %v1149_v28, %v785_v56  ;;  %v791_v54 = vand.u32 2147483648, %v1755_v1 }
  0xa8   : > { %v807_v21 = vmul.f32 %v1153_v22, %v806_v53  ;;  %976 = vst.msk [vmem:[%s1508_s16 + $0x78] sm:$0xff] %vm180_vm0, %v768_v35  ;;  %v777_v60 = vsel %vm776_vm4, %v1731_v26, %v775_v27  ;;  %vm800_vm8 = vcmp.eq.f32.partialorder %v1768_v18, inf  ;;  %vm802_vm9 = vcmp.eq.f32.partialorder %v1768_v18, 0.0 }
  0xa9   : > { %v797_v19 = vsub.f32 1.5, %v796_v32  ;;  %v780_v38 = vsel %vm778_vm5, %v779_v55, %v777_v60  ;;  %v787_v9 = vmul.f32 %v786_v5, %v1755_v1  ;;  %v1841_v40 = vmul.f32 0.11111111, %v535_v0 }
  0xaa   : > { %v1155_v31 = vpop.eup %1154  ;;  %v808_v36 = vmul.f32 0.5, %v807_v21  ;;  %977 = vst.msk [vmem:[%s1508_s16 + $0x80] sm:$0xff] %vm180_vm0, %v780_v38  ;;  %v504_v28 = vadd.f32 %v1595_v16, %v1588_v8  ;;  %v505_v37 = vadd.f32 %v1597_v6, %v1590_v29  ;;  %v803_v45 = vand.u32 2147483648, %v1768_v18 }
  0xab   : > { %v798_v47 = vmul.f32 %v1151_v46, %v797_v19  ;;  %v818_v30 = vmul.f32 %v1155_v31, %v1803_v43  ;;  %v789_v26 = vsel %vm788_vm6, %v1755_v1, %v787_v9  ;;  %1158 = vrsqrt.f32 %v1841_v40 }
  0xac   : > { %v809_v13 = vsub.f32 1.5, %v808_v36  ;;  %v1157_v55 = vpop.eup %1156  ;;  %v792_v61 = vsel %vm790_vm7, %v791_v54, %v789_v26  ;;  %vm812_vm10 = vcmp.eq.f32.partialorder %v1770_v20, inf  ;;  %vm814_vm11 = vcmp.eq.f32.partialorder %v1770_v20, 0.0  ;;  %v441_v54 = vld [vmem:[#allocation2 + $0x182] sm:$0xff] }
  0xad   : > { %v799_v34 = vmul.f32 %v798_v47, %v1768_v18  ;;  %v819_v8 = vmul.f32 %v1155_v31, %v818_v30  ;;  %978 = vst.msk [vmem:[%s1508_s16 + $0x88] sm:$0xff] %vm180_vm0, %v792_v61  ;;  %v830_v25 = vmul.f32 %v1157_v55, %v1808_v42  ;;  %v536_v7 = vadd.f32 %v504_v28, %v1599_v14 }
  0xae   : > { %v810_v29 = vmul.f32 %v1153_v22, %v809_v13  ;;  %v537_v4 = vadd.f32 %v505_v37, %v1604_v11  ;;  %v506_v24 = vadd.f32 %v1599_v14, %v1595_v16  ;;  %v815_v33 = vand.u32 2147483648, %v1770_v20 }
  0xaf   : > { %v801_v1 = vsel %vm800_vm8, %v1768_v18, %v799_v34  ;;  %v820_v23 = vmul.f32 0.5, %v819_v8  ;;  %v831_v59 = vmul.f32 %v1157_v55, %v830_v25  ;;  %v1873_v39 = vmul.f32 0.11111111, %v536_v7 }
  0xb0   : > { %v804_v46 = vsel %vm802_vm9, %v803_v45, %v801_v1  ;;  %v811_v48 = vmul.f32 %v810_v29, %v1770_v20  ;;  %v1878_v22 = vmul.f32 0.11111111, %v537_v4  ;;  %v538_v16 = vadd.f32 %v506_v24, %v1743_v57  ;;  %v442_v4 = vld [vmem:[#allocation2 + $0x18a] sm:$0xff] }
  0xb1   : > { %979 = vst.msk [vmem:[%s1508_s16 + $0x90] sm:$0xff] %vm180_vm0, %v804_v46  ;;  %v821_v63 = vsub.f32 1.5, %v820_v23  ;;  %v1159_v2 = vpop.eup %1158  ;;  %v832_v50 = vmul.f32 0.5, %v831_v59  ;;  %1160 = vrsqrt.f32 %v1873_v39  ;;  %v507_v3 = vadd.f32 %v1604_v11, %v1597_v6  ;;  %v443_v23 = vld [vmem:[#allocation2 + $0x19a] sm:$0xff] }
  0xb2   : > { %v813_v18 = vsel %vm812_vm10, %v1770_v20, %v811_v48  ;;  %v1888_v49 = vadd.f32 %v440_v10, %v1745_v58  ;;  %v842_v53 = vmul.f32 %v1159_v2, %v1841_v40  ;;  %v406_v0 = vadd.f32 %v370_v12, %v334_v41 }
  0xb3   : > { %v816_v51 = vsel %vm814_vm11, %v815_v33, %v813_v18  ;;  %v822_v56 = vmul.f32 %v1155_v31, %v821_v63  ;;  %vm824_vm12 = vcmp.eq.f32.partialorder %v1803_v43, inf  ;;  %v833_v62 = vsub.f32 1.5, %v832_v50  ;;  %v444_v63 = vld [vmem:[#allocation2 + $0x1a2] sm:$0xff] }
  0xb4   : > { %980 = vst.msk [vmem:[%s1508_s16 + $0x98] sm:$0xff] %vm180_vm0, %v816_v51  ;;  %1162 = vrsqrt.f32 %v1878_v22  ;;  %vm826_vm13 = vcmp.eq.f32.partialorder %v1803_v43, 0.0  ;;  %v827_v6 = vand.u32 2147483648, %v1803_v43  ;;  %v843_v58 = vmul.f32 %v1159_v2, %v842_v53 }
  0xb5   : > { %v823_v27 = vmul.f32 %v822_v56, %v1803_v43  ;;  %v834_v20 = vmul.f32 %v1157_v55, %v833_v62  ;;  %v1900_v32 = vmul.f32 0.11111111, %v538_v16  ;;  %v539_v35 = vadd.f32 %v507_v3, %v1760_v17 }
  0xb6   : > { %v508_v5 = vadd.f32 %v1743_v57, %v1599_v14  ;;  %vm836_vm14 = vcmp.eq.f32.partialorder %v1808_v42, inf  ;;  %v844_v60 = vmul.f32 0.5, %v843_v58  ;;  %v509_v19 = vadd.f32 %v1760_v17, %v1604_v11 }
  0xb7   : > { %v825_v21 = vsel %vm824_vm12, %v1803_v43, %v823_v27  ;;  %v1161_v31 = vpop.eup %1160  ;;  %v835_v9 = vmul.f32 %v834_v20, %v1808_v42  ;;  %1164 = vrsqrt.f32 %v1900_v32  ;;  %v477_v36 = vadd.f32 %v441_v54, %v1762_v44 }
  0xb8   : > { %v828_v38 = vsel %vm826_vm13, %v827_v6, %v825_v21  ;;  %vm838_vm15 = vcmp.eq.f32.partialorder %v1808_v42, 0.0  ;;  %v839_v14 = vand.u32 2147483648, %v1808_v42  ;;  %v845_v43 = vsub.f32 1.5, %v844_v60 }
  0xb9   : > { %981 = vst.msk [vmem:[%s1508_s16 + $0xa0] sm:$0xff] %vm180_vm0, %v828_v38  ;;  %v854_v47 = vmul.f32 %v1161_v31, %v1873_v39  ;;  %v837_v11 = vsel %vm836_vm14, %v1808_v42, %v835_v9  ;;  %v1918_v28 = vmul.f32 0.11111111, %v539_v35  ;;  %v540_v37 = vadd.f32 %v508_v5, %v1888_v49 }
  0xba   : > { %v1163_v30 = vpop.eup %1162  ;;  %v541_v26 = vadd.f32 %v509_v19, %v477_v36  ;;  %v840_v45 = vsel %vm838_vm15, %v839_v14, %v837_v11  ;;  %v846_v13 = vmul.f32 %v1159_v2, %v845_v43  ;;  %vm848_vm1 = vcmp.eq.f32.partialorder %v1841_v40, inf }
  0xbb   : > { %v855_v44 = vmul.f32 %v1161_v31, %v854_v47  ;;  %v866_v55 = vmul.f32 %v1163_v30, %v1878_v22  ;;  %982 = vst.msk [vmem:[%s1508_s16 + $0xa8] sm:$0xff] %vm180_vm0, %v840_v45  ;;  %vm850_vm2 = vcmp.eq.f32.partialorder %v1841_v40, 0.0  ;;  %v851_v61 = vand.u32 2147483648, %v1841_v40 }
  0xbc   : > { %1166 = vrsqrt.f32 %v1918_v28  ;;  %v847_v42 = vmul.f32 %v846_v13, %v1841_v40  ;;  %v1929_v29 = vmul.f32 0.11111111, %v540_v37  ;;  %vm860_vm3 = vcmp.eq.f32.partialorder %v1873_v39, inf }
  0xbd   : > { %v856_v34 = vmul.f32 0.5, %v855_v44  ;;  %v867_v8 = vmul.f32 %v1163_v30, %v866_v55  ;;  %v1165_v25 = vpop.eup %1164  ;;  %vm862_vm4 = vcmp.eq.f32.partialorder %v1873_v39, 0.0  ;;  %v863_v7 = vand.u32 2147483648, %v1873_v39 }
  0xbe   : > { %v1934_v1 = vmul.f32 0.11111111, %v541_v26  ;;  %v849_v24 = vsel %vm848_vm1, %v1841_v40, %v847_v42  ;;  %v878_v48 = vmul.f32 %v1165_v25, %v1900_v32  ;;  %1168 = vrsqrt.f32 %v1929_v29 }
  0xbf   : > { %v857_v41 = vsub.f32 1.5, %v856_v34  ;;  %v868_v46 = vmul.f32 0.5, %v867_v8  ;;  %v852_v59 = vsel %vm850_vm2, %v851_v61, %v849_v24  ;;  %v478_v12 = vadd.f32 %v442_v4, %v406_v0 }
  0xc0   : > { %v510_v33 = vadd.f32 %v1888_v49, %v1743_v57  ;;  %983 = vst.msk [vmem:[%s1508_s16 + $0xb0] sm:$0xff] %vm180_vm0, %v852_v59  ;;  %vm872_vm5 = vcmp.eq.f32.partialorder %v1878_v22, inf  ;;  %v879_v10 = vmul.f32 %v1165_v25, %v878_v48  ;;  %vm874_vm6 = vcmp.eq.f32.partialorder %v1878_v22, 0.0 }
  0xc1   : > { %v858_v16 = vmul.f32 %v1161_v31, %v857_v41  ;;  %v869_v2 = vsub.f32 1.5, %v868_v46  ;;  %v875_v40 = vand.u32 2147483648, %v1878_v22  ;;  %1170 = vrsqrt.f32 %v1934_v1 }
  0xc2   : > { %v1167_v18 = vpop.eup %1166  ;;  %v479_v50 = vadd.f32 %v443_v23, %v1425_v52  ;;  %v880_v51 = vmul.f32 0.5, %v879_v10  ;;  %v542_v53 = vadd.f32 %v510_v33, %v478_v12  ;;  %v511_v0 = vadd.f32 %v477_v36, %v1760_v17 }
  0xc3   : > { %v859_v3 = vmul.f32 %v858_v16, %v1873_v39  ;;  %v870_v57 = vmul.f32 %v1163_v30, %v869_v2  ;;  %v890_v56 = vmul.f32 %v1167_v18, %v1918_v28  ;;  %v480_v62 = vadd.f32 %v444_v63, %v1439_v15 }
  0xc4   : > { %v512_v27 = vadd.f32 %v478_v12, %v1888_v49  ;;  %v881_v58 = vsub.f32 1.5, %v880_v51  ;;  %v1169_v35 = vpop.eup %1168  ;;  %v1961_v54 = vmul.f32 0.11111111, %v542_v53  ;;  %v543_v17 = vadd.f32 %v511_v0, %v479_v50 }
  0xc5   : > { %v861_v6 = vsel %vm860_vm3, %v1873_v39, %v859_v3  ;;  %v871_v52 = vmul.f32 %v870_v57, %v1878_v22  ;;  %v891_v20 = vmul.f32 %v1167_v18, %v890_v56  ;;  %v902_v19 = vmul.f32 %v1169_v35, %v1929_v29 }
  0xc6   : > { %v864_v5 = vsel %vm862_vm4, %v863_v7, %v861_v6  ;;  %v544_v21 = vadd.f32 %v512_v27, %v480_v62  ;;  %v882_v49 = vmul.f32 %v1165_v25, %v881_v58  ;;  %vm884_vm7 = vcmp.eq.f32.partialorder %v1900_v32, inf }
  0xc7   : > { %984 = vst.msk [vmem:[%s1508_s16 + $0xb8] sm:$0xff] %vm180_vm0, %v864_v5  ;;  %v873_v15 = vsel %vm872_vm5, %v1878_v22, %v871_v52  ;;  %v892_v60 = vmul.f32 0.5, %v891_v20  ;;  %v1171_v31 = vpop.eup %1170  ;;  %1172 = vrsqrt.f32 %v1961_v54  ;;  %v903_v36 = vmul.f32 %v1169_v35, %v902_v19 }
  0xc8   : > { %v876_v38 = vsel %vm874_vm6, %v875_v40, %v873_v15  ;;  %v883_v39 = vmul.f32 %v882_v49, %v1900_v32  ;;  %v914_v14 = vmul.f32 %v1171_v31, %v1934_v1  ;;  %vm886_vm8 = vcmp.eq.f32.partialorder %v1900_v32, 0.0 }
  0xc9   : > { %985 = vst.msk [vmem:[%s1508_s16 + $0xc0] sm:$0xff] %vm180_vm0, %v876_v38  ;;  %v893_v9 = vsub.f32 1.5, %v892_v60  ;;  %v887_v43 = vand.u32 2147483648, %v1900_v32  ;;  %v1979_v47 = vmul.f32 0.11111111, %v543_v17  ;;  %v904_v37 = vmul.f32 0.5, %v903_v36 }
  0xca   : > { %v1981_v22 = vmul.f32 0.11111111, %v544_v21  ;;  %v885_v30 = vsel %vm884_vm7, %v1900_v32, %v883_v39  ;;  %v915_v26 = vmul.f32 %v1171_v31, %v914_v14  ;;  %vm896_vm9 = vcmp.eq.f32.partialorder %v1918_v28, inf }
  0xcb   : > { %v894_v11 = vmul.f32 %v1167_v18, %v893_v9  ;;  %v888_v45 = vsel %vm886_vm8, %v887_v43, %v885_v30  ;;  %1174 = vrsqrt.f32 %v1979_v47  ;;  %v905_v44 = vsub.f32 1.5, %v904_v37 }
  0xcc   : > { %986 = vst.msk [vmem:[%s1508_s16 + $0xc8] sm:$0xff] %vm180_vm0, %v888_v45  ;;  %v916_v55 = vmul.f32 0.5, %v915_v26  ;;  %vm898_vm10 = vcmp.eq.f32.partialorder %v1918_v28, 0.0  ;;  %v899_v32 = vand.u32 2147483648, %v1918_v28  ;;  %1176 = vrsqrt.f32 %v1981_v22 }
  0xcd   : > { %v895_v13 = vmul.f32 %v894_v11, %v1918_v28  ;;  %v1173_v61 = vpop.eup %1172  ;;  %v906_v34 = vmul.f32 %v1169_v35, %v905_v44  ;;  %vm908_vm11 = vcmp.eq.f32.partialorder %v1929_v29, inf  ;;  %vm910_vm12 = vcmp.eq.f32.partialorder %v1929_v29, 0.0 }
  0xce   : > { %v917_v8 = vsub.f32 1.5, %v916_v55  ;;  %v926_v25 = vmul.f32 %v1173_v61, %v1961_v54  ;;  %v911_v46 = vand.u32 2147483648, %v1929_v29  ;;  %vm920_vm13 = vcmp.eq.f32.partialorder %v1934_v1, inf }
  0xcf   : > { %v897_v42 = vsel %vm896_vm9, %v1918_v28, %v895_v13  ;;  %v907_v23 = vmul.f32 %v906_v34, %v1929_v29  ;;  %vm922_vm14 = vcmp.eq.f32.partialorder %v1934_v1, 0.0  ;;  %v923_v16 = vand.u32 2147483648, %v1934_v1 }
  0xd0   : > { %v900_v7 = vsel %vm898_vm10, %v899_v32, %v897_v42  ;;  %v918_v4 = vmul.f32 %v1171_v31, %v917_v8  ;;  %v927_v24 = vmul.f32 %v1173_v61, %v926_v25  ;;  %vm932_vm15 = vcmp.eq.f32.partialorder %v1961_v54, inf }
  0xd1   : > { %987 = vst.msk [vmem:[%s1508_s16 + $0xd0] sm:$0xff] %vm180_vm0, %v900_v7  ;;  %v1175_v41 = vpop.eup %1174  ;;  %v909_v28 = vsel %vm908_vm11, %v1929_v29, %v907_v23  ;;  %v935_v0 = vand.u32 2147483648, %v1961_v54  ;;  %vm934_vm1 = vcmp.eq.f32.partialorder %v1961_v54, 0.0  ;;  %vm944_vm2 = vcmp.eq.f32.partialorder %v1979_v47, inf }
  0xd2   : > { %v919_v48 = vmul.f32 %v918_v4, %v1934_v1  ;;  %v928_v59 = vmul.f32 0.5, %v927_v24  ;;  %v938_v12 = vmul.f32 %v1175_v41, %v1979_v47  ;;  %v1177_v33 = vpop.eup %1176  ;;  %v912_v63 = vsel %vm910_vm12, %v911_v46, %v909_v28 }
  0xd3   : > { %988 = vst.msk [vmem:[%s1508_s16 + $0xd8] sm:$0xff] %vm180_vm0, %v912_v63  ;;  %v950_v29 = vmul.f32 %v1177_v33, %v1981_v22  ;;  %v947_v20 = vand.u32 2147483648, %v1979_v47  ;;  %vm946_vm3 = vcmp.eq.f32.partialorder %v1979_v47, 0.0  ;;  %vm956_vm4 = vcmp.eq.f32.partialorder %v1981_v22, inf }
  0xd4   : > { %v921_v2 = vsel %vm920_vm13, %v1934_v1, %v919_v48  ;;  %v929_v10 = vsub.f32 1.5, %v928_v59  ;;  %v939_v18 = vmul.f32 %v1175_v41, %v938_v12  ;;  %v959_v17 = vand.u32 2147483648, %v1981_v22 }
  0xd5   : > { %v924_v40 = vsel %vm922_vm14, %v923_v16, %v921_v2  ;;  %v951_v57 = vmul.f32 %v1177_v33, %v950_v29  ;;  %vm958_vm5 = vcmp.eq.f32.partialorder %v1981_v22, 0.0 }
  0xd6   : > { %989 = vst.msk [vmem:[%s1508_s16 + $0xe0] sm:$0xff] %vm180_vm0, %v924_v40  ;;  %v930_v50 = vmul.f32 %v1173_v61, %v929_v10  ;;  %v940_v3 = vmul.f32 0.5, %v939_v18 }
  0xd7   : > { %v952_v53 = vmul.f32 0.5, %v951_v57 }
  0xd8   : > { %v931_v51 = vmul.f32 %v930_v50, %v1961_v54  ;;  %v941_v56 = vsub.f32 1.5, %v940_v3 }
  0xd9   : > { %v953_v27 = vsub.f32 1.5, %v952_v53 }
  0xda   : > { %v933_v1 = vsel %vm932_vm15, %v1961_v54, %v931_v51  ;;  %v942_v62 = vmul.f32 %v1175_v41, %v941_v56 }
  0xdb   : > { %v936_v6 = vsel %vm934_vm1, %v935_v0, %v933_v1  ;;  %v954_v58 = vmul.f32 %v1177_v33, %v953_v27 }
  0xdc   : > { %990 = vst.msk [vmem:[%s1508_s16 + $0xe8] sm:$0xff] %vm180_vm0, %v936_v6  ;;  %v943_v52 = vmul.f32 %v942_v62, %v1979_v47 }
  0xdd   : > { %v955_v5 = vmul.f32 %v954_v58, %v1981_v22 }
  0xde   : > { %v945_v35 = vsel %vm944_vm2, %v1979_v47, %v943_v52 }
  0xdf   : > { %v948_v54 = vsel %vm946_vm3, %v947_v20, %v945_v35  ;;  %v957_v21 = vsel %vm956_vm4, %v1981_v22, %v955_v5 }
  0xe0   : > { %991 = vst.msk [vmem:[%s1508_s16 + $0xf0] sm:$0xff] %vm180_vm0, %v948_v54  ;;  %v960_v15 = vsel %vm958_vm5, %v959_v17, %v957_v21 }
  0xe1   : > { %992 = vst.msk [vmem:[%s1508_s16 + $0xf8] sm:$0xff] %vm180_vm0, %v960_v15 }
  0xe2 PF: > { %s11_s8 = sadd.s32 1, %s1200_s8   ;;  %s2044_s6 = smov %s1196_s7 }
  0xe3   : > { %p8_p5 = scmp.ge.s32.totalorder %s11_s8, 4   ;;  %s2045_s7 = smov %s2047_s9 }
  0xe5   :  { %10 = sbr.rel (!%p8_p5) target bundleno = 2 (0x2), region = 55 }

</bundles_post_ra>
